<compile_context>
chip_gen: v6e
topology: v6e:2x2x1
jax: 0.10.0
libtpu: 0.0.40
codegen_flags: <defaults>
</compile_context>

<pallas_src>
from collections import namedtuple

import jax
import jax.numpy as jnp
from jax.experimental import pallas as pl
from jax.experimental.pallas import tpu as pltpu

B, S, D, H, O = 2, 8, 32, 64, 32   # small shapes consistent with the forward
BS = B * S
O_PAD = 128                        # lane-dense output slab width


def _inner_model_kernel(x_ref, w1_ref, b1_ref, w2_ref, b2_ref, pw_ref,
                        logits_ref, pooled_ref):
    # Entire problem fits in VMEM -> single grid point, full-array blocks.
    x = x_ref[...]            # (BS, D)      f32
    w1 = w1_ref[...]          # (D, H)
    b1 = b1_ref[...]          # (1, H)       lane-aligned row, free VPU broadcast
    w2 = w2_ref[...]          # (H, O_PAD)   zero-padded beyond O
    b2 = b2_ref[...]          # (1, O_PAD)
    pool_w = pw_ref[...]      # (B, BS)      precomputed mask / denom selector

    # Layer 1: one MXU pass over the collapsed (B*S, D) slab.
    h = jnp.dot(x, w1, preferred_element_type=jnp.float32) + b1
    h = jax.nn.gelu(h)        # tanh approx (EUP); see TODO above re: erf parity
    # Layer 2: one MXU pass, lane-dense (BS, O_PAD) result.
    logits = jnp.dot(h, w2, preferred_element_type=jnp.float32) + b2
    # Masked-mean pooling: single MXU op, mask and 1/denom are baked into pool_w.
    pooled = jnp.dot(pool_w, logits, preferred_element_type=jnp.float32)

    logits_ref[...] = logits.astype(logits_ref.dtype)   # unmasked 128-lane vst
    pooled_ref[...] = pooled.astype(pooled_ref.dtype)


def _inner_model_impl(input_x, mask_x, params):
    """Synthetic inner model: returns a dict of endpoints (like many torch models)."""
    w1, b1, w2, b2 = params

    # Layout prep done in the (jitted) wrapper, not inside the kernel:
    x2d = input_x.reshape(BS, D)                         # collapse batch & seq
    b1r = b1.reshape(1, H)                               # pre-broadcast-shaped bias
    w2p = jnp.pad(w2, ((0, 0), (0, O_PAD - O)))          # lane-pad O -> 128
    b2p = jnp.pad(b2.reshape(1, O), ((0, 0), (0, O_PAD - O)))

    # Pooling-weight matrix: pool_w[b, r] = (batch(r) == b) * mask[r] / max(sum mask[b], 1)
    m2d = mask_x.reshape(B, S).astype(jnp.float32)
    denom = jnp.maximum(jnp.sum(m2d, axis=1, keepdims=True), 1.0)     # (B, 1)
    row_w = (m2d / denom).reshape(1, BS)                              # per-row weight
    batch_of_row = jnp.arange(BS, dtype=jnp.int32) // S               # (BS,)
    onehot = (batch_of_row[None, :] == jnp.arange(B, dtype=jnp.int32)[:, None])
    pool_w = onehot.astype(jnp.float32) * row_w                       # (B, BS)

    vmem_spec = pl.BlockSpec(memory_space=pltpu.MemorySpace.VMEM)

    flops = 2 * BS * D * H + 2 * BS * H * O_PAD + 2 * B * BS * O_PAD
    bytes_accessed = 4 * (BS * D + D * H + H + H * O_PAD + O_PAD + B * BS
                          + BS * O_PAD + B * O_PAD)
    cost = pl.CostEstimate(flops=flops, transcendentals=BS * H,
                           bytes_accessed=bytes_accessed)

    logits_pad, pooled_pad = pl.pallas_call(
        _inner_model_kernel,
        out_shape=(
            jax.ShapeDtypeStruct((BS, O_PAD), jnp.float32),   # lane-dense slab
            jax.ShapeDtypeStruct((B, O_PAD), jnp.float32),
        ),
        in_specs=[vmem_spec] * 6,
        out_specs=(vmem_spec, vmem_spec),
        cost_estimate=cost,
    )(x2d, w1, b1r, w2p, b2p, pool_w)

    logits = logits_pad[:, :O].reshape(B, S, O)
    pooled = pooled_pad[:, :O]
    return {"logits": logits, "pooled": pooled}


# JIT the whole inner model (pallas_call + layout plumbing): at these shapes
# wall time is dominated by dispatch, which this removes after the first call.
_inner_model_jit = jax.jit(_inner_model_impl)


def inner_model(input_x, mask_x, params):
    return _inner_model_jit(input_x, mask_x, params)


def model_wrapper_forward(input_x, mask_x, params):
    """JAX equivalent of ModelWrapper.forward."""
    data = inner_model(input_x, mask_x, params)
    if isinstance(data, dict):
        data_named_tuple = namedtuple('ModelEndpoints', sorted(data.keys()))
        data = data_named_tuple(**data)
    elif isinstance(data, list):
        data = tuple(data)
    return data


def init_params(key):
    k1, k2, k3, k4 = jax.random.split(key, 4)
    w1 = jax.random.normal(k1, (D, H), jnp.float32) * (1.0 / jnp.sqrt(D))
    b1 = jax.random.normal(k2, (H,), jnp.float32) * 0.02
    w2 = jax.random.normal(k3, (H, O), jnp.float32) * (1.0 / jnp.sqrt(H))
    b2 = jax.random.normal(k4, (O,), jnp.float32) * 0.02
    return (w1, b1, w2, b2)


if __name__ == "__main__":
    key = jax.random.PRNGKey(0)
    kx, km, kp = jax.random.split(key, 3)

    input_x = jax.random.normal(kx, (B, S, D), jnp.float32)
    # Binary mask over the sequence (1.0 = keep), deterministic from the key.
    mask_x = (jax.random.uniform(km, (B, S)) > 0.3).astype(jnp.float32)
    params = init_params(kp)

    out = model_wrapper_forward(input_x, mask_x, params)
    jax.block_until_ready(out)

    # Wrapper semantics: dict -> namedtuple with sorted field names.
    assert type(out).__name__ == "ModelEndpoints"
    assert out._fields == ("logits", "pooled")
    assert out.logits.shape == (B, S, O)
    assert out.pooled.shape == (B, O)

    # Sanity check vs a pure-JAX reference of the same inner model.
    w1, b1, w2, b2 = params
    h_ref = jax.nn.gelu(jnp.einsum('bsd,dh->bsh', input_x, w1) + b1)
    logits_ref = jnp.einsum('bsh,ho->bso', h_ref, w2) + b2
    m3 = mask_x[:, :, None]
    denom_ref = jnp.maximum(jnp.sum(mask_x, axis=1, keepdims=True), 1.0)
    pooled_ref = jnp.sum(logits_ref * m3, axis=1) / denom_ref
    assert jnp.allclose(out.logits, logits_ref, atol=1e-4, rtol=1e-4)
    assert jnp.allclose(out.pooled, pooled_ref, atol=1e-4, rtol=1e-4)

    print("KERNEL_OK")
</pallas_src>

<mosaic_0001>
module attributes {stable_mosaic.version = 11 : i64} {
  func.func @_inner_model_kernel(%arg0: memref<16x32xf32, #tpu.memory_space<vmem>>, %arg1: memref<32x64xf32, #tpu.memory_space<vmem>>, %arg2: memref<1x64xf32, #tpu.memory_space<vmem>>, %arg3: memref<64x128xf32, #tpu.memory_space<vmem>>, %arg4: memref<1x128xf32, #tpu.memory_space<vmem>>, %arg5: memref<2x16xf32, #tpu.memory_space<vmem>>, %arg6: memref<16x128xf32, #tpu.memory_space<vmem>>, %arg7: memref<2x128xf32, #tpu.memory_space<vmem>>) attributes {dimension_semantics = [], scalar_prefetch = 0 : i64, scratch_operands = 0 : i64, tpu.core_type = #tpu.core_type<tc>} {
    %c0 = arith.constant 0 : index
    %c0_0 = arith.constant 0 : index
    %0 = vector.load %arg0[%c0, %c0_0] : memref<16x32xf32, #tpu.memory_space<vmem>>, vector<16x32xf32>
    %c0_1 = arith.constant 0 : index
    %c0_2 = arith.constant 0 : index
    %1 = vector.load %arg1[%c0_1, %c0_2] : memref<32x64xf32, #tpu.memory_space<vmem>>, vector<32x64xf32>
    %c0_3 = arith.constant 0 : index
    %c0_4 = arith.constant 0 : index
    %2 = vector.load %arg2[%c0_3, %c0_4] : memref<1x64xf32, #tpu.memory_space<vmem>>, vector<1x64xf32>
    %c0_5 = arith.constant 0 : index
    %c0_6 = arith.constant 0 : index
    %3 = vector.load %arg3[%c0_5, %c0_6] : memref<64x128xf32, #tpu.memory_space<vmem>>, vector<64x128xf32>
    %c0_7 = arith.constant 0 : index
    %c0_8 = arith.constant 0 : index
    %4 = vector.load %arg4[%c0_7, %c0_8] : memref<1x128xf32, #tpu.memory_space<vmem>>, vector<1x128xf32>
    %c0_9 = arith.constant 0 : index
    %c0_10 = arith.constant 0 : index
    %5 = vector.load %arg5[%c0_9, %c0_10] : memref<2x16xf32, #tpu.memory_space<vmem>>, vector<2x16xf32>
    %cst = arith.constant dense<0.000000e+00> : vector<16x64xf32>
    %6 = tpu.matmul %0, %1, %cst {dimension_numbers = #tpu.dot_dimension_numbers<[1], [0], [0], [1], [0, 0, 1, 1], [], []>} : vector<16x32xf32>, vector<32x64xf32>, vector<16x64xf32> -> vector<16x64xf32>
    %7 = vector.broadcast %2 : vector<1x64xf32> to vector<16x64xf32>
    %8 = arith.addf %6, %7 : vector<16x64xf32>
    %9 = arith.mulf %8, %8 : vector<16x64xf32>
    %10 = arith.mulf %8, %9 : vector<16x64xf32>
    %cst_11 = arith.constant 4.471500e-02 : f32
    %11 = vector.broadcast %cst_11 : f32 to vector<16x64xf32>
    %12 = arith.mulf %11, %10 : vector<16x64xf32>
    %13 = arith.addf %8, %12 : vector<16x64xf32>
    %cst_12 = arith.constant 0.797884583 : f32
    %14 = vector.broadcast %cst_12 : f32 to vector<16x64xf32>
    %15 = arith.mulf %14, %13 : vector<16x64xf32>
    %16 = math.tanh %15 : vector<16x64xf32>
    %cst_13 = arith.constant 1.000000e+00 : f32
    %17 = vector.broadcast %cst_13 : f32 to vector<16x64xf32>
    %18 = arith.addf %17, %16 : vector<16x64xf32>
    %cst_14 = arith.constant 5.000000e-01 : f32
    %19 = vector.broadcast %cst_14 : f32 to vector<16x64xf32>
    %20 = arith.mulf %19, %18 : vector<16x64xf32>
    %21 = arith.mulf %8, %20 : vector<16x64xf32>
    %cst_15 = arith.constant dense<0.000000e+00> : vector<16x128xf32>
    %22 = tpu.matmul %21, %3, %cst_15 {dimension_numbers = #tpu.dot_dimension_numbers<[1], [0], [0], [1], [0, 0, 1, 1], [], []>} : vector<16x64xf32>, vector<64x128xf32>, vector<16x128xf32> -> vector<16x128xf32>
    %23 = vector.broadcast %4 : vector<1x128xf32> to vector<16x128xf32>
    %24 = arith.addf %22, %23 : vector<16x128xf32>
    %cst_16 = arith.constant dense<0.000000e+00> : vector<2x128xf32>
    %25 = tpu.matmul %5, %24, %cst_16 {dimension_numbers = #tpu.dot_dimension_numbers<[1], [0], [0], [1], [0, 0, 1, 1], [], []>} : vector<2x16xf32>, vector<16x128xf32>, vector<2x128xf32> -> vector<2x128xf32>
    %c0_17 = arith.constant 0 : index
    %c0_18 = arith.constant 0 : index
    %26 = vector.load %arg6[%c0_17, %c0_18] : memref<16x128xf32, #tpu.memory_space<vmem>>, vector<16x128xf32>
    tpu.vector_store %arg6[%c0_17, %c0_18], %24 {strides = array<i32>} : memref<16x128xf32, #tpu.memory_space<vmem>>, vector<16x128xf32>,
    %c0_19 = arith.constant 0 : index
    %c0_20 = arith.constant 0 : index
    %27 = vector.load %arg7[%c0_19, %c0_20] : memref<2x128xf32, #tpu.memory_space<vmem>>, vector<2x128xf32>
    tpu.vector_store %arg7[%c0_19, %c0_20], %25 {strides = array<i32>} : memref<2x128xf32, #tpu.memory_space<vmem>>, vector<2x128xf32>,
    return
  }
}

</mosaic_0001>

<bundles_post_ra>
// kernel: mul.5
= control target key start
LH: loop header
LB: loop body
LE: loop exit
PB: predicated region body
PF: predicated region fallthrough
CT: control target
= control target key end

     0   :  { %vm8_vm0 = vcmask 64512   ;;  %vm14_vm1 = vcmask 130112   ;;  %s42_s0 = inlined_call_operand.vmem [shape: f32[2,8], index: 0, kind: input, shape index: {}]   ;;  %s43_s1 = inlined_call_operand.vmem [shape: f32[16], index: 1, kind: output, shape index: {}]  }
   0x1   :  { %v5_v0 = vld [vmem:[%s42_s0] sm:$0x3]  ;;  %s25_s0 = smov 8  }
   0x2   :  { %6 = vst [vmem:[#allocation1] sm:$0x3] %v5_v0 }
   0x9   :  { %v11_v1 = vld [vmem:[#allocation1 + $0x1] sm:$0x1]   ;;  %v7_v2 = vld [vmem:[#allocation1] sm:$0x1]  }
   0xa   :  { %12 = vrot.lane.b32.xlu0 %v11_v1, %s25_s0  ;;  %9 = vst.msk [vmem:[#allocation0] sm:$0x1] %vm8_vm0, %v7_v2  }
  0x7c   :  { %v13_v3 = vpop.permute.xlu0 %12  }
  0x7d   :  { %15 = vst.msk [vmem:[#allocation0] sm:$0x1] %vm14_vm1, %v13_v3  }
  0x84   :  { %v20_v4 = vld [vmem:[#allocation0] sm:$0x1] }
  0x85   :  { %23 = vst [vmem:[%s43_s1] sm:$0x1] %v20_v4 }

// kernel: _inner_model_impl.1
= control target key start
LH: loop header
LB: loop body
LE: loop exit
PB: predicated region body
PF: predicated region fallthrough
CT: control target
= control target key end

     0   :  { %vm49_vm0 = vcmask 261120   ;;  %s527_s0 = inlined_call_operand.vmem [shape: f32[16,32], index: 0, kind: input, shape index: {}]   ;;  %s528_s1 = inlined_call_operand.vmem [shape: f32[32,64], index: 1, kind: input, shape index: {}]   ;;  %s529_s2 = inlined_call_operand.vmem [shape: f32[1,64], index: 2, kind: input, shape index: {}]   ;;  %s530_s3 = inlined_call_operand.vmem [shape: f32[64,128], index: 3, kind: input, shape index: {}]   ;;  %s531_s4 = inlined_call_operand.vmem [shape: f32[1,128], index: 4, kind: input, shape index: {}]   ;;  %s532_s5 = inlined_call_operand.vmem [shape: f32[2,16], index: 5, kind: input, shape index: {}]   ;;  %s533_s6 = inlined_call_operand.vmem [shape: f32[16,128], index: 6, kind: output, shape index: {0}]   ;;  %s534_s7 = inlined_call_operand.hbm [shape: f32[2,128], index: 7, kind: output, shape index: {1}]  }
   0x1   :  { %v31_v0 = vld [vmem:[%s528_s1 + $0x18] sm:$0xff]  ;;  %v30_v1 = vld [vmem:[%s528_s1 + $0x10] sm:$0xff]  ;;  %v26_v2 = vld [vmem:[%s527_s0] sm:$0xff] }
   0x2   :  { %358 = vmatprep.subr.mxu0 %v31_v0  ;;  %v29_v3 = vld [vmem:[%s528_s1 + $0x8] sm:$0xff]  ;;  %366 = vmatprep.mubr.msk.f32.mxu0 %vm49_vm0, %v26_v2 }
   0x3   :  { %359 = vmatpush3.msra.mxu0 %v31_v0 }
   0x4   :  { %13 = vsyncpa [#allocation3], 0  ;;  %360 = vmatprep.subr.mxu0 %v30_v1  ;;  %v28_v4 = vld [vmem:[%s528_s1] sm:$0xff]  ;;  %v27_v5 = vld [vmem:[%s527_s0 + $0x8] sm:$0xff]  ;;  %vm155_vm1 = vcmask 523264   ;;  %v424_v37 = vmov 0.0  }
   0x5   :  { %361 = vmatpush3.msra.mxu0 %v30_v1  ;;  %v40_v6 = vld [vmem:[%s530_s3 + $0x38] sm:$0xff]  ;;  %v39_v7 = vld [vmem:[%s530_s3 + $0x30] sm:$0xff]  ;;  %v38_v8 = vld [vmem:[%s530_s3 + $0x28] sm:$0xff]  ;;  %vm425_vm2 = vmmov 0   ;;  %vm237_vm3 = vcmask 130048  }
   0x6   :  { %362 = vmatprep.subr.mxu0 %v29_v3  ;;  %369 = vmatprep.subr.mxu1 %v40_v6  ;;  %v37_v9 = vld [vmem:[%s530_s3 + $0x20] sm:$0xff]  ;;  %v36_v10 = vld [vmem:[%s530_s3 + $0x18] sm:$0xff]  ;;  %v35_v11 = vld [vmem:[%s530_s3 + $0x10] sm:$0xff] }
   0x7   :  { %363 = vmatpush3.msra.mxu0 %v29_v3  ;;  %370 = vmatpush3.msra.mxu1 %v40_v6  ;;  %v34_v12 = vld [vmem:[%s530_s3 + $0x8] sm:$0xff]  ;;  %v33_v13 = vld [vmem:[%s530_s3] sm:$0xff] }
   0x8   :  { %364 = vmatprep.subr.mxu0 %v28_v4  ;;  %371 = vmatprep.subr.mxu1 %v39_v7  ;;  %v332_v14 = vld [vmem:[%s529_s2] ss:$0 sm:$0xff] }
   0x9   :  { %365 = vmatpush3.msra.mxu0 %v28_v4  ;;  %372 = vmatpush3.msra.mxu1 %v39_v7  ;;  %v335_v38 = vld [vmem:[%s531_s4] ss:$0 sm:$0xff]  ;;  %s426_s4 = smov [#allocation2]  }
   0xa   :  { %367 = vmatmul.mubr.msk.f32.vlgmr.msra.gmra.mxu0 %vm49_vm0, %v27_v5  ;;  %373 = vmatprep.subr.mxu1 %v38_v8  ;;  %v42_v43 = vld [vmem:[%s532_s5] sm:$0x3]  ;;  %s322_s12 = sshll.u32 %s426_s4, 4  ;;  %s323_s12 = int_to_ptr.vmem [resolvable:$true] %s322_s12 }
   0xb   :  { %374 = vmatpush3.msra.mxu1 %v38_v8  ;;  %388 = vmatprep.subr.mxu0 %v424_v37  ;;  %s402_s13 = scalar_lea.vmem %s323_s12, 32  ;;  %p407_p1 = scmp.lt.s32.totalorder %s323_s12, %s323_s12 }
   0xc   :  { %375 = vmatprep.subr.mxu1 %v37_v9  ;;  %392 = vmatprep.mubr.msk.f32.mxu0 %vm425_vm2, %v424_v37  ;;  %p403_p0 = scmp.ne.s32.totalorder %s323_s12, %s402_s13  ;;  %p408_p2 = scmp.lt.s32.totalorder %s402_s13, %s402_s13 }
   0xd   :  { %376 = vmatpush3.msra.mxu1 %v37_v9 }
   0xe   :  { %377 = vmatprep.subr.mxu1 %v36_v10  ;;  %p409_p3 = por %p408_p2, %p407_p1 }
   0xf   :  { %378 = vmatpush3.msra.mxu1 %v36_v10 }
  0x10   :  { %379 = vmatprep.subr.mxu1 %v35_v11  ;;  %p410_p4 = pnand %p409_p3, %p403_p0 }
  0x11   :  { %380 = vmatpush3.msra.mxu1 %v35_v11 }
  0x12   :  { %381 = vmatprep.subr.mxu1 %v34_v12 }
  0x13   :  { %382 = vmatpush3.msra.mxu1 %v34_v12 }
  0x14   :  { %383 = vmatprep.subr.mxu1 %v33_v13 }
  0x15   :  { %384 = vmatpush3.msra.mxu1 %v33_v13 }
  0xca   :  { %v368_v15 = vpop.f32.mrf.mxu0 }
  0xcb   :  { %v128_v16 = vadd.f32 %v368_v15, %v332_v14 }
  0xcc   :  { %v122_v17 = vpop.f32.mrf.mxu0 }
  0xcd   :  { %v132_v18 = vmul.f32 %v128_v16, %v128_v16  ;;  %v123_v19 = vadd.f32 %v332_v14, %v122_v17 }
  0xcf   :  { %v134_v20 = vmul.f32 %v132_v18, %v128_v16  ;;  %v131_v21 = vmul.f32 %v123_v19, %v123_v19 }
  0xd1   :  { %v136_v22 = vmul.f32 0.044715, %v134_v20  ;;  %v133_v23 = vmul.f32 %v131_v21, %v123_v19 }
  0xd3   :  { %v138_v24 = vadd.f32 %v136_v22, %v128_v16  ;;  %v135_v25 = vmul.f32 0.044715, %v133_v23 }
  0xd5   :  { %v140_v26 = vmul.f32 0.7978846, %v138_v24  ;;  %v137_v27 = vadd.f32 %v135_v25, %v123_v19 }
  0xd7   :  { %398 = vtanh.f32 %v140_v26  ;;  %v139_v28 = vmul.f32 0.7978846, %v137_v27 }
  0xd9   :  { %400 = vtanh.f32 %v139_v28 }
  0xe4   :  { %v399_v29 = vpop.eup %398 }
  0xe5   :  { %v144_v30 = vadd.f32 1.0, %v399_v29 }
  0xe6   :  { %v401_v31 = vpop.eup %400 }
  0xe7   :  { %v143_v32 = vadd.f32 1.0, %v401_v31  ;;  %v146_v33 = vmul.f32 0.5, %v144_v30 }
  0xe9   :  { %v145_v34 = vmul.f32 0.5, %v143_v32  ;;  %v148_v36 = vmul.f32 %v146_v33, %v128_v16 }
  0xeb   :  { %v147_v35 = vmul.f32 %v145_v34, %v123_v19 }
  0xed   :  { %385 = vmatprep.mubr.msk.f32.mxu1 %vm155_vm1, %v147_v35 }
  0xee   :  { %386 = vmatmul.mubr.msk.f32.vlgmr.msra.gmra.mxu1 %vm155_vm1, %v148_v36 }
 0x1ae   :  { %v387_v39 = vpop.f32.mrf.mxu1 }
 0x1af   :  { %v234_v40 = vadd.f32 %v387_v39, %v335_v38 }
 0x1b0   :  { %v228_v41 = vpop.f32.mrf.mxu1 }
 0x1b1   :  { %312 = vst [vmem:[%s533_s6 + $0x8] sm:$0xff] %v234_v40  ;;  %v229_v42 = vadd.f32 %v335_v38, %v228_v41  ;;  %389 = vmatpush3.msra.mxu0 %v234_v40 }
 0x1b2   :  { %390 = vmatprep.subr.mxu0 %v424_v37 }
 0x1b3   :  { %311 = vst [vmem:[%s533_s6] sm:$0xff] %v229_v42  ;;  %391 = vmatpush3.msra.mxu0 %v229_v42 }
 0x1b4   :  { %393 = vmatmul.mubr.msk.f32.vlgmr.msra.gmra.mxu0 %vm237_vm3, %v42_v43 }
 0x274   :  { %v307_v44 = vpop.f32.mrf.mxu0 }
 0x275   :  { %313 = vst [vmem:[#allocation2] sm:$0x3] %v307_v44 }
 0x276   :  { %v394_v45 = vpop.f32.mrf.mxu0 }
 0x277   :  { %413 = shalt.err (!%p410_p4)
}
 0x278   :  { %325 = dma.vmem_to_hbm [thread:$0]  %s323_s12, 32, %s534_s7, [#allocation3]  }
 0x279   :  { %422 = dma.done.wait [#allocation3], 32  }
 0x27a   :  { %423 = vsyncadd [#allocation3], 4294967264 }
 0x27b   :  { %331 = vsyncpa [#allocation3], 1 }

</bundles_post_ra>
